<compile_context>
chip_gen: v7x
topology: tpu7x:2x2x1
jax: 0.10.0
libtpu: 0.0.40
codegen_flags: <defaults>
</compile_context>

<pallas_src>
import functools

import jax
import jax.numpy as jnp
from jax.experimental import pallas as pl
from jax.experimental.pallas import tpu as pltpu


def _conv_bn_relu_kernel(x_ref, wbig_ref, bias_ref, o_ref, *, ks):
    # x_ref:    (Nb, H+2p, W*Cin)     bf16, vertically pre-padded NHWC rows
    # wbig_ref: (ks, W*Cin, Wo*Cout)  bf16 block-Toeplitz weight (BN scale folded)
    # bias_ref: (1, Wo*Cout)          f32 folded BN bias, tiled per output column
    # o_ref:    (Nb, Ho, Wo*Cout)     f32 lane-dense output block
    Nb, Hp, WC = x_ref.shape
    _, Ho, WoC = o_ref.shape
    M = Nb * Ho

    xp = x_ref[...]                                        # whole tile, bf16

    # f32 accumulator starts at the folded BN bias (saves an epilogue add).
    acc = jnp.broadcast_to(bias_ref[...], (M, WoC))

    # ks accumulating MXU matmuls, one per vertical tap.  Horizontal taps and
    # horizontal zero padding are already folded into wbig.
    for kh in range(ks):
        lhs = xp[:, kh:kh + Ho, :].reshape(M, WC)          # (N*Ho, W*Cin) bf16
        acc = acc + jnp.dot(lhs, wbig_ref[kh],
                            preferred_element_type=jnp.float32)

    # Epilogue: ReLU only (BN scale folded into weights, bias in acc init).
    o_ref[...] = jnp.maximum(acc, 0.0).reshape(Nb, Ho, WoC).astype(o_ref.dtype)


def prepare_conv_bn_relu_params(weight_oihw, gamma, beta, running_mean,
                                running_var, *, W, padding=1, eps=1e-5):
    """One-time prep (per weight set): eval-mode BN folding + Toeplitz weight.

    Hoisted out of the forward path — weights are static at inference.
    Returns:
      wbig:     (ks, W*Cin, Wo*Cout) bfloat16 block-Toeplitz weight
      bias_row: (1, Wo*Cout)         float32 folded BN bias per output column
    """
    Cout, Cin, ks, ks2 = weight_oihw.shape
    assert ks == ks2
    Wo = W + 2 * padding - ks + 1

    scale = gamma / jnp.sqrt(running_var + eps)                   # (Cout,)
    bias = beta - running_mean * scale                            # (Cout,)
    w_hwio = jnp.transpose(weight_oihw, (2, 3, 1, 0))             # (ks,ks,Cin,Cout)
    w_scaled = w_hwio * scale[None, None, None, :]

    # Block-Toeplitz per vertical tap kh:
    #   row = r*Cin + ci   (input column r, NHWC row order)
    #   col = w*Cout + co  (output column w)
    #   val = w_scaled[kh, r - w + padding, ci, co] if in range else 0
    # The zero entries implement the horizontal zero padding.
    r = jnp.arange(W)[:, None]                  # (W, 1)
    w = jnp.arange(Wo)[None, :]                 # (1, Wo)
    kw = r - w + padding                        # (W, Wo)
    valid = (kw >= 0) & (kw < ks)
    kw_c = jnp.clip(kw, 0, ks - 1)

    gathered = w_scaled[:, kw_c]                # (ks, W, Wo, Cin, Cout)
    gathered = gathered * valid[None, :, :, None, None]
    wbig = gathered.transpose(0, 1, 3, 2, 4).reshape(ks, W * Cin, Wo * Cout)

    bias_row = jnp.tile(bias, Wo).reshape(1, Wo * Cout)
    return wbig.astype(jnp.bfloat16), bias_row.astype(jnp.float32)


def conv_bn_relu(x_nchw, wbig, bias_row, *, ks=3, padding=1, batch_tiles=1):
    """Matches ConvBNReLU.forward (eval-mode BN), stride=1. Input/output NCHW.

    batch_tiles: number of grid steps the batch is split across.
      1 (default) -> single fused matmul, best on single-TC v5e/v6e.
      2           -> keeps both v7x TensorCores busy (one half-batch each).
    """
    N, Cin, H, W = x_nchw.shape
    Ho = H + 2 * padding - ks + 1
    Wo = W + 2 * padding - ks + 1
    assert Ho > 0 and Wo > 0
    WC = W * Cin
    WoC = wbig.shape[-1]
    Cout = WoC // Wo
    Hp = H + 2 * padding
    assert wbig.shape == (ks, WC, WoC)
    assert N % batch_tiles == 0
    Nb = N // batch_tiles

    # TODO(synk): keep activations NHWC / (H, W*C) model-wide so this NCHW
    # transpose (kept only for PyTorch interface parity) disappears.
    x_rows = jnp.transpose(x_nchw, (0, 2, 3, 1)).reshape(N, H, WC)
    # Vertical zero padding shipped pre-padded (off the kernel hot path);
    # horizontal padding already lives inside the Toeplitz weight.
    xp = jnp.pad(x_rows, ((0, 0), (padding, padding), (0, 0)))
    xp = xp.astype(jnp.bfloat16)                 # feed the MXU bf16

    out_flat = pl.pallas_call(
        functools.partial(_conv_bn_relu_kernel, ks=ks),
        out_shape=jax.ShapeDtypeStruct((N, Ho, WoC), jnp.float32),
        grid_spec=pltpu.PrefetchScalarGridSpec(
            num_scalar_prefetch=0,
            grid=(batch_tiles,),
            in_specs=[
                pl.BlockSpec((Nb, Hp, WC), lambda t: (t, 0, 0)),
                # Constant block index -> weight/bias fetched once, resident.
                pl.BlockSpec((ks, WC, WoC), lambda t: (0, 0, 0)),
                pl.BlockSpec((1, WoC), lambda t: (0, 0)),
            ],
            out_specs=pl.BlockSpec((Nb, Ho, WoC), lambda t: (t, 0, 0)),
        ),
        compiler_params=pltpu.CompilerParams(
            dimension_semantics=("parallel",),
        ),
    )(xp, wbig, bias_row)

    out_nhwc = out_flat.reshape(N, Ho, Wo, Cout)
    # TODO(synk): emit bf16 and stay NHWC downstream; transpose kept for
    # PyTorch NCHW output parity only.
    return jnp.transpose(out_nhwc, (0, 3, 1, 2))


def _reference(x_nchw, weight_oihw, gamma, beta, running_mean, running_var,
               *, padding=1, eps=1e-5):
    y = jax.lax.conv_general_dilated(
        x_nchw, weight_oihw, window_strides=(1, 1),
        padding=((padding, padding), (padding, padding)),
        dimension_numbers=("NCHW", "OIHW", "NCHW"))
    scale = (gamma / jnp.sqrt(running_var + eps)).reshape(1, -1, 1, 1)
    bias = (beta - running_mean * gamma / jnp.sqrt(running_var + eps)).reshape(1, -1, 1, 1)
    return jnp.maximum(y * scale + bias, 0.0)


if __name__ == "__main__":
    # Small shapes consistent with the module: ConvBNReLU(in_chan=4, out_chan=8)
    N, Cin, H, W = 2, 4, 16, 16
    Cout, ks, padding = 8, 3, 1

    key = jax.random.PRNGKey(0)
    kx, kw, kg, kb, km, kv = jax.random.split(key, 6)

    x = jax.random.normal(kx, (N, Cin, H, W), jnp.float32)

    # Conv weight: kaiming_normal_(a=1) -> gain = 1, std = 1/sqrt(fan_in),
    # fan_in = Cin*ks*ks.  No conv bias.
    fan_in = Cin * ks * ks
    weight = jax.random.normal(kw, (Cout, Cin, ks, ks), jnp.float32) / jnp.sqrt(fan_in)

    # BatchNorm2d parameters / running stats (deterministic, non-trivial).
    gamma = 1.0 + 0.1 * jax.random.normal(kg, (Cout,), jnp.float32)
    beta = 0.1 * jax.random.normal(kb, (Cout,), jnp.float32)
    running_mean = 0.1 * jax.random.normal(km, (Cout,), jnp.float32)
    running_var = 1.0 + 0.1 * jnp.abs(jax.random.normal(kv, (Cout,), jnp.float32))

    # --- one-time weight prep (hoisted out of the forward path) ---
    wbig, bias_row = prepare_conv_bn_relu_params(
        weight, gamma, beta, running_mean, running_var, W=W, padding=padding)
    wbig, bias_row = jax.block_until_ready((wbig, bias_row))

    # --- forward (the recurring, kernel-bearing path) ---
    run = jax.jit(functools.partial(conv_bn_relu, ks=ks, padding=padding,
                                    batch_tiles=1))
    out = jax.block_until_ready(run(x, wbig, bias_row))

    ref = _reference(x, weight, gamma, beta, running_mean, running_var,
                     padding=padding)
    Ho = H + 2 * padding - ks + 1
    Wo = W + 2 * padding - ks + 1
    assert out.shape == (N, Cout, Ho, Wo)
    # bf16 MXU inputs -> loosened tolerance vs the f32 reference.
    assert jnp.allclose(out, ref, atol=2e-2, rtol=2e-2), "mismatch vs reference"

    print("KERNEL_OK")
</pallas_src>

<mosaic_0001>
module attributes {stable_mosaic.version = 11 : i64} {
  func.func @_conv_bn_relu_kernel(%arg0: i32, %arg1: memref<2x18x64xbf16, #tpu.memory_space<vmem>>, %arg2: memref<3x64x128xbf16, #tpu.memory_space<vmem>>, %arg3: memref<1x128xf32, #tpu.memory_space<vmem>>, %arg4: memref<2x16x128xf32, #tpu.memory_space<vmem>>) attributes {dimension_semantics = [#tpu.dimension_semantics<parallel>], iteration_bounds = array<i64: 1>, scalar_prefetch = 0 : i64, scratch_operands = 0 : i64, tpu.core_type = #tpu.core_type<tc>, window_params = [{transform_indices = @transform_0, window_bounds = array<i64: 2, 18, 64>}, {pipeline_mode = #tpu.pipeline_mode<synchronous>, transform_indices = @transform_1, window_bounds = array<i64: 3, 64, 128>}, {pipeline_mode = #tpu.pipeline_mode<synchronous>, transform_indices = @transform_2, window_bounds = array<i64: 1, 128>}, {transform_indices = @transform_3, window_bounds = array<i64: 2, 16, 128>}]} {
    %c0 = arith.constant 0 : index
    %c0_0 = arith.constant 0 : index
    %c0_1 = arith.constant 0 : index
    %0 = vector.load %arg1[%c0, %c0_0, %c0_1] : memref<2x18x64xbf16, #tpu.memory_space<vmem>>, vector<2x18x64xbf16>
    %c0_2 = arith.constant 0 : index
    %c0_3 = arith.constant 0 : index
    %1 = vector.load %arg3[%c0_2, %c0_3] : memref<1x128xf32, #tpu.memory_space<vmem>>, vector<1x128xf32>
    %2 = vector.shape_cast %1 : vector<1x128xf32> to vector<1x128xf32>
    %3 = vector.broadcast %2 : vector<1x128xf32> to vector<32x128xf32>
    %4 = vector.extract_strided_slice %0 {offsets = [0, 0, 0], sizes = [2, 16, 64], strides = [1, 1, 1]} : vector<2x18x64xbf16> to vector<2x16x64xbf16>
    %5 = vector.shape_cast %4 : vector<2x16x64xbf16> to vector<32x64xbf16>
    %c0_4 = arith.constant 0 : index
    %c0_5 = arith.constant 0 : index
    %c0_6 = arith.constant 0 : index
    %6 = vector.load %arg2[%c0_4, %c0_5, %c0_6] : memref<3x64x128xbf16, #tpu.memory_space<vmem>>, vector<1x64x128xbf16>
    %7 = vector.shape_cast %6 : vector<1x64x128xbf16> to vector<64x128xbf16>
    %cst = arith.constant dense<0.000000e+00> : vector<32x128xf32>
    %8 = tpu.matmul %5, %7, %cst {dimension_numbers = #tpu.dot_dimension_numbers<[1], [0], [0], [1], [0, 0, 1, 1], [], []>} : vector<32x64xbf16>, vector<64x128xbf16>, vector<32x128xf32> -> vector<32x128xf32>
    %9 = arith.addf %3, %8 : vector<32x128xf32>
    %10 = vector.extract_strided_slice %0 {offsets = [0, 1, 0], sizes = [2, 16, 64], strides = [1, 1, 1]} : vector<2x18x64xbf16> to vector<2x16x64xbf16>
    %11 = vector.shape_cast %10 : vector<2x16x64xbf16> to vector<32x64xbf16>
    %c1 = arith.constant 1 : index
    %c0_7 = arith.constant 0 : index
    %c0_8 = arith.constant 0 : index
    %12 = vector.load %arg2[%c1, %c0_7, %c0_8] : memref<3x64x128xbf16, #tpu.memory_space<vmem>>, vector<1x64x128xbf16>
    %13 = vector.shape_cast %12 : vector<1x64x128xbf16> to vector<64x128xbf16>
    %cst_9 = arith.constant dense<0.000000e+00> : vector<32x128xf32>
    %14 = tpu.matmul %11, %13, %cst_9 {dimension_numbers = #tpu.dot_dimension_numbers<[1], [0], [0], [1], [0, 0, 1, 1], [], []>} : vector<32x64xbf16>, vector<64x128xbf16>, vector<32x128xf32> -> vector<32x128xf32>
    %15 = arith.addf %9, %14 : vector<32x128xf32>
    %16 = vector.extract_strided_slice %0 {offsets = [0, 2, 0], sizes = [2, 16, 64], strides = [1, 1, 1]} : vector<2x18x64xbf16> to vector<2x16x64xbf16>
    %17 = vector.shape_cast %16 : vector<2x16x64xbf16> to vector<32x64xbf16>
    %c2 = arith.constant 2 : index
    %c0_10 = arith.constant 0 : index
    %c0_11 = arith.constant 0 : index
    %18 = vector.load %arg2[%c2, %c0_10, %c0_11] : memref<3x64x128xbf16, #tpu.memory_space<vmem>>, vector<1x64x128xbf16>
    %19 = vector.shape_cast %18 : vector<1x64x128xbf16> to vector<64x128xbf16>
    %cst_12 = arith.constant dense<0.000000e+00> : vector<32x128xf32>
    %20 = tpu.matmul %17, %19, %cst_12 {dimension_numbers = #tpu.dot_dimension_numbers<[1], [0], [0], [1], [0, 0, 1, 1], [], []>} : vector<32x64xbf16>, vector<64x128xbf16>, vector<32x128xf32> -> vector<32x128xf32>
    %21 = arith.addf %15, %20 : vector<32x128xf32>
    %cst_13 = arith.constant 0.000000e+00 : f32
    %22 = vector.broadcast %cst_13 : f32 to vector<32x128xf32>
    %23 = arith.maximumf %21, %22 : vector<32x128xf32>
    %24 = vector.shape_cast %23 : vector<32x128xf32> to vector<2x16x128xf32>
    %c0_14 = arith.constant 0 : index
    %c0_15 = arith.constant 0 : index
    %c0_16 = arith.constant 0 : index
    %25 = vector.load %arg4[%c0_14, %c0_15, %c0_16] : memref<2x16x128xf32, #tpu.memory_space<vmem>>, vector<2x16x128xf32>
    tpu.vector_store %arg4[%c0_14, %c0_15, %c0_16], %24 {strides = array<i32>} : memref<2x16x128xf32, #tpu.memory_space<vmem>>, vector<2x16x128xf32>,
    return
  }
  func.func @transform_0(%arg0: i32) -> (i32, i32, i32) {
    %c0_i32 = arith.constant 0 : i32
    %c0_i32_0 = arith.constant 0 : i32
    %c0_i32_1 = arith.constant 0 : i32
    return %arg0, %c0_i32, %c0_i32_0 : i32, i32, i32
  }
  func.func @transform_1(%arg0: i32) -> (i32, i32, i32) {
    %c0_i32 = arith.constant 0 : i32
    %c0_i32_0 = arith.constant 0 : i32
    %c0_i32_1 = arith.constant 0 : i32
    %c0_i32_2 = arith.constant 0 : i32
    return %c0_i32, %c0_i32_0, %c0_i32_1 : i32, i32, i32
  }
  func.func @transform_2(%arg0: i32) -> (i32, i32) {
    %c0_i32 = arith.constant 0 : i32
    %c0_i32_0 = arith.constant 0 : i32
    %c0_i32_1 = arith.constant 0 : i32
    return %c0_i32, %c0_i32_0 : i32, i32
  }
  func.func @transform_3(%arg0: i32) -> (i32, i32, i32) {
    %c0_i32 = arith.constant 0 : i32
    %c0_i32_0 = arith.constant 0 : i32
    %c0_i32_1 = arith.constant 0 : i32
    return %arg0, %c0_i32, %c0_i32_0 : i32, i32, i32
  }
}

</mosaic_0001>

<bundles_post_ra>
// kernel: conv_bn_relu.1
= control target key start
LH: loop header
LB: loop body
LE: loop exit
PB: predicated region body
PF: predicated region fallthrough
CT: control target
= control target key end

     0   :  { %vm130_vm0 = vsmask.f32 3328  ;;  %vm131_vm1 = vsmask.f32 7440  ;;  %vm70_vm2 = vcmask 523264   ;;  %vm281_vm3 = vcmask 1042432   ;;  %s686_s1 = inlined_call_operand.vmem [shape: bf16[3,64,128], index: 1, kind: input, shape index: {}]   ;;  %s687_s0 = inlined_call_operand.vmem [shape: bf16[2,18,64], index: 0, kind: input, shape index: {}]   ;;  %s688_s2 = inlined_call_operand.vmem [shape: f32[1,128], index: 2, kind: input, shape index: {}]   ;;  %s689_s3 = inlined_call_operand.vmem [shape: f32[2,16,128], index: 3, kind: output, shape index: {}]  }
   0x1   :  { %v517_v0 = vld [vmem:[%s686_s1 + $0x20] sm:$0xff]   ;;  %v518_v1 = vld [vmem:[%s686_s1 + $0x28] sm:$0xff]   ;;  %v519_v3 = vld [vmem:[%s686_s1 + $0x30] sm:$0xff]   ;;  %vm282_vm4 = vcmask 1046532  }
   0x2   :  { %481 = vmatprep.subr.bf16.mxu0 %v517_v0  ;;  %v520_v2 = vld [vmem:[%s686_s1] sm:$0xff]   ;;  %v522_v4 = vld [vmem:[%s686_s1 + $0x8] sm:$0xff]   ;;  %v521_v12 = vld [vmem:[%s686_s1 + $0x38] sm:$0xff]  }
   0x3   :  { %482 = vmatpush3.bf16.msra.mxu0 %v517_v0  ;;  %469 = vmatprep.subr.bf16.mxu1 %v520_v2  ;;  %v569_v5 = vld [vmem:[%s687_s0] sm:$0xf]  ;;  %v574_v6 = vld [vmem:[%s687_s0 + $0x4] sm:$0xf]  ;;  %v579_v7 = vld [vmem:[%s687_s0 + $0x8] sm:$0x1] }
   0x4   :  { %483 = vmatprep.subr.bf16.mxu0 %v518_v1  ;;  %470 = vmatpush3.bf16.msra.mxu1 %v520_v2  ;;  %v134_v8 = vshrl.u32 %v569_v5, 16  ;;  %v137_v9 = vshll.u32 %v569_v5, 16  ;;  %v143_v10 = vshll.u32 %v574_v6, 16  ;;  %v147_v11 = vshrl.u32 %v574_v6, 16  ;;  %v524_v14 = vld [vmem:[%s686_s1 + $0x10] sm:$0xff]   ;;  %vm615_vm5 = vmor %vm130_vm0, %vm131_vm1  ;;  %v523_v30 = vld [vmem:[%s686_s1 + $0x40] sm:$0xff]  }
   0x5   :  { %471 = vmatprep.subr.bf16.mxu1 %v522_v4  ;;  %v153_v13 = vshll.u32 %v579_v7, 16  ;;  %v409_v15 = vcombine.low %v569_v5, %v574_v6  ;;  %v597_v20 = vld [vmem:[%s687_s0 + $0xc] sm:$0xf]  ;;  %v602_v22 = vld [vmem:[%s687_s0 + $0x10] sm:$0xf]  ;;  %v526_v39 = vld [vmem:[%s686_s1 + $0x18] sm:$0xff]  }
   0x6   :  { %v136_v16 = vrot.slane %v134_v8, 4  ;;  %v139_v17 = vrot.slane %v137_v9, 5  ;;  %v145_v18 = vrot.slane %v143_v10, 5  ;;  %v149_v19 = vrot.slane %v147_v11, 4  ;;  %v607_v23 = vld [vmem:[%s687_s0 + $0x14] sm:$0x1]  ;;  %vm633_vm6 = vmor %vm281_vm3, %vm282_vm4 }
   0x7   :  { %484 = vmatpush3.bf16.msra.mxu0 %v518_v1  ;;  %v155_v21 = vrot.slane %v153_v13, 5  ;;  %v158_v24 = vshrl.u32 %v597_v20, 16  ;;  %477 = vmatprep.mubr.msk.bf16.mxu1 %vm70_vm2, %v409_v15  ;;  %v161_v27 = vshll.u32 %v597_v20, 16  ;;  %v167_v28 = vshll.u32 %v602_v22, 16  ;;  %v525_v58 = vld [vmem:[%s686_s1 + $0x48] sm:$0xff]   ;;  %v527_v62 = vld [vmem:[%s686_s1 + $0x50] sm:$0xff]  }
   0x8   :  { %485 = vmatprep.subr.bf16.mxu0 %v519_v3  ;;  %472 = vmatpush3.bf16.msra.mxu1 %v522_v4  ;;  %v140_v25 = vor.u32 %v139_v17, %v136_v16  ;;  %v150_v26 = vor.u32 %v149_v19, %v145_v18  ;;  %v171_v32 = vshrl.u32 %v602_v22, 16  ;;  %v177_v33 = vshll.u32 %v607_v23, 16  ;;  %v530_v2 = vld [vmem:[%s686_s1 + $0x58] sm:$0xff]   ;;  %v408_v10 = vld [vmem:[%s688_s2] ss:$0 sm:$0xff] }
   0x9   :  { %473 = vmatprep.subr.bf16.mxu1 %v524_v14  ;;  %v160_v31 = vrot.slane %v158_v24, 4  ;;  %v163_v36 = vrot.slane %v161_v27, 5  ;;  %v169_v37 = vrot.slane %v167_v28, 5  ;;  %v433_v47 = vrot.slane %v569_v5, 9 }
   0xa   :  { %v141_v34 = vrot.slane %v140_v25, 4  ;;  %v151_v35 = vrot.slane %v150_v26, 4  ;;  %v173_v38 = vrot.slane %v171_v32, 4  ;;  %v179_v45 = vrot.slane %v177_v33, 5 }
   0xb   :  { %486 = vmatpush3.bf16.msra.mxu0 %v519_v3  ;;  %v164_v42 = vor.u32 %v163_v36, %v160_v31  ;;  %v289_v48 = vrot.slane %v579_v7, 5  ;;  %v410_v50 = vcombine.low %v597_v20, %v602_v22  ;;  %v286_v51 = vrot.slane %v574_v6, 5 }
   0xc   :  { %487 = vmatprep.subr.bf16.mxu0 %v521_v12  ;;  %474 = vmatpush3.bf16.msra.mxu1 %v524_v14  ;;  %v146_v40 = vsel %vm615_vm5, %v141_v34, %v145_v18  ;;  %v156_v41 = vsel %vm615_vm5, %v151_v35, %v155_v21  ;;  %v174_v44 = vor.u32 %v173_v38, %v169_v37  ;;  %v293_v61 = vrot.slane %v602_v22, 5 }
   0xd   :  { %v425_v43 = vcombine.low %v146_v40, %v156_v41  ;;  %475 = vmatprep.subr.bf16.mxu1 %v526_v39  ;;  %v165_v49 = vrot.slane %v164_v42, 4  ;;  %v287_v54 = vsel %vm633_vm6, %v433_v47, %v286_v51  ;;  %v288_v55 = vrot.slane %v286_v51, 4 }
   0xe   :  { %v175_v52 = vrot.slane %v174_v44, 4  ;;  %v296_v63 = vrot.slane %v607_v23, 5  ;;  %v434_v0 = vrot.slane %v597_v20, 9  ;;  %v295_v1 = vrot.slane %v293_v61, 4 }
   0xf   :  { %488 = vmatpush3.bf16.msra.mxu0 %v521_v12  ;;  %489 = vmatprep.mubr.msk.bf16.mxu0 %vm70_vm2, %v425_v43  ;;  %v170_v53 = vsel %vm615_vm5, %v165_v49, %v169_v37  ;;  %v290_v59 = vsel %vm633_vm6, %v288_v55, %v289_v48 }
  0x10   :  { %493 = vmatprep.subr.bf16.mxu0 %v523_v30  ;;  %476 = vmatpush3.bf16.msra.mxu1 %v526_v39  ;;  %v180_v56 = vsel %vm615_vm5, %v175_v52, %v179_v45  ;;  %v443_v60 = vcombine.low %v287_v54, %v290_v59  ;;  %v294_v3 = vsel %vm633_vm6, %v434_v0, %v293_v61 }
  0x11   :  { %v426_v57 = vcombine.low %v170_v53, %v180_v56  ;;  %v297_v4 = vsel %vm633_vm6, %v295_v1, %v296_v63 }
  0x12   :  { %v444_v5 = vcombine.low %v294_v3, %v297_v4 }
  0x13   :  { %478 = vmatmul.mubr.msk.bf16.vlgmr.msra.gmra.mrb[0].mxu1 %vm70_vm2, %v410_v50  ;;  %490 = vmatmul.mubr.msk.bf16.vlgmr.msra.gmra.mrb[0].mxu0 %vm70_vm2, %v426_v57 }
  0x14   :  { %494 = vmatpush3.bf16.msra.mxu0 %v523_v30  ;;  %501 = vmatprep.mubr.msk.bf16.mxu0 %vm70_vm2, %v443_v60 }
  0x15   :  { %495 = vmatprep.subr.bf16.mxu0 %v525_v58 }
  0x18   :  { %496 = vmatpush3.bf16.msra.mxu0 %v525_v58 }
  0x19   :  { %497 = vmatprep.subr.bf16.mxu0 %v527_v62 }
  0x1c   :  { %498 = vmatpush3.bf16.msra.mxu0 %v527_v62 }
  0x1d   :  { %499 = vmatprep.subr.bf16.mxu0 %v530_v2 }
  0x20   :  { %500 = vmatpush3.bf16.msra.mxu0 %v530_v2 }
  0x23   :  { %502 = vmatmul.mubr.msk.bf16.vlgmr.msra.gmra.mrb[0].mxu0 %vm70_vm2, %v444_v5 }
  0xe6   :  { %v479_v6 = vpop.f32.mrb[0].mxu1 }
  0xe7   :  { %v111_v7 = vpop.f32.mrb[1].mxu1  ;;  %v128_v11 = vadd.f32 %v479_v6, %v408_v10 }
  0xe8   :  { %v480_v8 = vpop.f32.mrb[2].mxu1  ;;  %v126_v12 = vadd.f32 %v408_v10, %v111_v7 }
  0xe9   :  { %v114_v9 = vpop.f32.mrb[3].mxu1  ;;  %v129_v14 = vadd.f32 %v480_v8, %v408_v10 }
  0xea   :  { %v127_v17 = vadd.f32 %v408_v10, %v114_v9 }
  0xf6   :  { %v503_v13 = vpop.f32.mrb[0].mxu0 }
  0xf7   :  { %v506_v15 = vadd.f32 %v503_v13, %v128_v11  ;;  %v377_v16 = vpop.f32.mrb[1].mxu0 }
  0xf8   :  { %v508_v18 = vadd.f32 %v377_v16, %v126_v12  ;;  %v504_v19 = vpop.f32.mrb[2].mxu0 }
  0xf9   :  { %v398_v20 = vmax.f32 %v506_v15, 0.0  ;;  %v510_v21 = vadd.f32 %v504_v19, %v129_v14  ;;  %v380_v22 = vpop.f32.mrb[3].mxu0 }
  0xfa   :  { %v396_v23 = vmax.f32 %v508_v18, 0.0  ;;  %v512_v24 = vadd.f32 %v380_v22, %v127_v17 }
  0xfb   :  { %402 = vst [vmem:[%s689_s3 + $0x10] sm:$0xff] %v398_v20  ;;  %v399_v25 = vmax.f32 %v510_v21, 0.0 }
  0xfc   :  { %400 = vst [vmem:[%s689_s3] sm:$0xff] %v396_v23  ;;  %v397_v26 = vmax.f32 %v512_v24, 0.0 }
  0xfd   :  { %403 = vst [vmem:[%s689_s3 + $0x18] sm:$0xff] %v399_v25 }
  0xfe   :  { %401 = vst [vmem:[%s689_s3 + $0x8] sm:$0xff] %v397_v26 }

</bundles_post_ra>
